<compile_context>
chip_gen: v5e
topology: v5e:2x2
jax: 0.10.0
libtpu: 0.0.40
codegen_flags: <defaults>
</compile_context>

<pallas_src>
import functools

import jax
import jax.numpy as jnp
from jax import lax
from jax.experimental import pallas as pl
from jax.experimental.pallas import tpu as pltpu


def _conv_gn_mish_kernel(x_ref, w_ref, oh_ref, oht_ref, p_ref, o_ref,
                         acc_ref, aff_ref, *, Bb, T, K, cg, eps):
    """One block of Bb batch samples per grid step.

    x_ref  : (Bb, T + K - 1, C_in)  bf16  time-padded input (time x channels)
    w_ref  : (K*C_in, C_pad)        bf16  im2col conv weight
    oh_ref : (C_pad, G)             f32   one-hot channel->group (zero rows for pad chans)
    oht_ref: (G, C_pad)             f32   transpose of the above
    p_ref  : (8, C_pad)             f32   rows 0/1/2 = conv bias / gamma / beta
    o_ref  : (Bb, T, C_out)         x.dtype  (only real channels hit HBM)
    acc_ref: (Bb, T, C_pad)         f32   VMEM scratch (conv result)
    aff_ref: (Bb, 2, C_pad)         f32   VMEM scratch (per-sample scale/shift)
    """
    C_pad = acc_ref.shape[-1]
    C_out = o_ref.shape[-1]
    C_in = x_ref.shape[-1]

    # --- Conv1d as one im2col matmul: contraction dim = K*C_in -------------
    x = x_ref[...]                                        # (Bb, T_pad, C_in) bf16
    xcol = jnp.concatenate([x[:, k:k + T, :] for k in range(K)], axis=-1)
    xcol = xcol.reshape(Bb * T, K * C_in)                 # (rows, K*C_in) bf16
    params = p_ref[...]                                   # (8, C_pad) f32
    conv = jnp.dot(xcol, w_ref[...], preferred_element_type=jnp.float32)
    conv = conv + params[0:1, :]                          # conv bias
    acc = conv.reshape(Bb, T, C_pad)
    acc_ref[...] = acc                                    # stash for chunked epilogue

    # --- GroupNorm stats: T-first VPU reduction, then tiny one-hot matmuls -
    onehot = oh_ref[...]                                  # (C_pad, G)
    oht = oht_ref[...]                                    # (G, C_pad)
    inv_n = 1.0 / (T * cg)
    sum_c = jnp.sum(acc, axis=1)                          # (Bb, C_pad)
    mean_g = jnp.dot(sum_c, onehot, preferred_element_type=jnp.float32) * inv_n
    mean_c = jnp.dot(mean_g, oht, preferred_element_type=jnp.float32)   # (Bb, C_pad)
    d = acc - mean_c[:, None, :]                          # two-pass variance
    sq_c = jnp.sum(d * d, axis=1)                         # (Bb, C_pad)
    var_g = jnp.dot(sq_c, onehot, preferred_element_type=jnp.float32) * inv_n
    rstd_g = lax.rsqrt(var_g + eps)                       # (Bb, G)
    rstd_c = jnp.dot(rstd_g, oht, preferred_element_type=jnp.float32)   # (Bb, C_pad)

    # Fold GroupNorm affine into one per-(sample, channel) scale/shift pair.
    scale = rstd_c * params[1:2, :]                       # rstd * gamma
    shift = params[2:3, :] - mean_c * scale               # beta - mean * rstd * gamma
    aff_ref[:, 0:1, :] = scale[:, None, :]
    aff_ref[:, 1:2, :] = shift[:, None, :]

    # --- Normalize + Mish epilogue, one sample at a time (small f32 temps) -
    def epilogue(b, carry):
        aff = aff_ref[b]                                  # (2, C_pad)
        y = acc_ref[b] * aff[0:1, :] + aff[1:2, :]        # (T, C_pad) f32
        # Mish: y*tanh(softplus(y)) == y * p(p+2) / (p(p+2)+2), p = e^y
        p = jnp.exp(jnp.minimum(y, 20.0))
        num = p * (p + 2.0)
        mish = y * num * pl.reciprocal(num + 2.0, approx=True)
        out = jnp.where(y > 20.0, y, mish)                # mish(y) ~= y for large y
        o_ref[b] = out[:, :C_out].astype(o_ref.dtype)     # only real channels stored
        return carry

    lax.fori_loop(0, Bb, epilogue, 0)


def _generation_config():
    """Returns (target matmul rows per grid step, vmem_limit_bytes, assume_2_tensorcores)."""
    vmem_cap = None
    try:
        vmem_cap = getattr(pltpu.get_tpu_info(), "vmem_capacity_bytes", None)
    except Exception:
        vmem_cap = None
    if vmem_cap is not None and vmem_cap > 100 * 1024 * 1024:
        # v5e / v6e: 128 MiB physical VMEM, single TensorCore -> big blocks.
        return 512, 100 * 1024 * 1024, False
    # v7x (64 MiB VMEM, 2 TensorCores) or unknown: conservative sizing.
    return 256, 48 * 1024 * 1024, True


def diffusion_conv1d_block(x, weight, bias, gamma, beta, *, n_groups=8, eps=1e-5):
    """x: (B, C_in, T), weight: (C_out, C_in, K), bias/gamma/beta: (C_out,).

    Returns (B, C_out, T) in x.dtype, matching
    nn.Conv1d(pad=K//2) -> GroupNorm(n_groups) -> Mish.
    """
    B, C_in, T = x.shape
    C_out, C_in_w, K = weight.shape
    assert C_in_w == C_in
    assert C_out % n_groups == 0, "GroupNorm requires C_out % n_groups == 0"
    assert K % 2 == 1, "padding=K//2 reproduces 'same' length only for odd K"
    pad = K // 2
    T_pad = T + 2 * pad
    cg = C_out // n_groups

    LANE = 128
    C_pad_ch = max(LANE, ((C_out + LANE - 1) // LANE) * LANE)   # compute-only padding
    out_dtype = x.dtype
    out_isize = jnp.dtype(out_dtype).itemsize

    target_rows, vmem_limit, two_tc = _generation_config()

    # Batch block: fill the MXU M-dim; keep >=2 grid steps on 2-TC chips so
    # dimension_semantics=("parallel",) actually uses both TensorCores.
    Bb = min(B, max(1, pl.cdiv(target_rows, T)))
    if two_tc and B >= 2:
        Bb = min(Bb, (B + 1) // 2)

    def step_vmem_bytes(bb):
        rows = bb * T
        x_blk = bb * T_pad * C_in * 2                      # bf16 input block
        o_blk = bb * T * C_out * out_isize                 # output block
        consts = K * C_in * C_pad_ch * 2 + (2 * n_groups + 8) * C_pad_ch * 4
        scratch = bb * T * C_pad_ch * 4 + bb * 2 * C_pad_ch * 4
        temps = rows * K * C_in * 2 + rows * C_pad_ch * 4 + 4 * T * C_pad_ch * 4
        return 2 * (x_blk + o_blk + consts) + scratch + temps   # 2x = double-buffering

    while Bb > 1 and step_vmem_bytes(Bb) > int(0.7 * vmem_limit):
        Bb = max(1, Bb // 2)
    # TODO(synk): for Bb == 1 with very large T*C_pad, additionally tile T inside
    # the kernel (accumulated two-pass stats) to stay within v7x's 64 MiB VMEM.
    B_pad = pl.cdiv(B, Bb) * Bb

    # Host-side glue (fuses into one XLA pass): NCT->NTC, zero-pad time halo +
    # batch remainder, cast matmul operands to bf16.
    # TODO(synk): in a full network keep the (B, T, C) layout between layers so
    # these transposes (an extra HBM round trip each) disappear entirely.
    x_tc = jnp.transpose(x, (0, 2, 1))
    x_tc = jnp.pad(x_tc, ((0, B_pad - B), (pad, pad), (0, 0))).astype(jnp.bfloat16)

    # im2col weight: (C_out, C_in, K) -> (K*C_in, C_pad), row index = k*C_in + ci
    # (matches the lane order of the in-kernel concatenation).
    w_mat = jnp.transpose(weight, (2, 1, 0)).reshape(K * C_in, C_out)
    w_mat = jnp.pad(w_mat, ((0, 0), (0, C_pad_ch - C_out))).astype(jnp.bfloat16)

    params = jnp.zeros((8, C_pad_ch), jnp.float32)
    params = params.at[0, :C_out].set(bias.astype(jnp.float32))
    params = params.at[1, :C_out].set(gamma.astype(jnp.float32))
    params = params.at[2, :C_out].set(beta.astype(jnp.float32))

    ch = jnp.arange(C_pad_ch, dtype=jnp.int32)
    grp = jnp.arange(n_groups, dtype=jnp.int32)
    onehot = ((ch[:, None] // cg) == grp[None, :]) & (ch[:, None] < C_out)
    onehot = onehot.astype(jnp.float32)                   # (C_pad, G), zero rows for pad
    onehot_t = onehot.T                                    # (G, C_pad)

    kernel = functools.partial(_conv_gn_mish_kernel, Bb=Bb, T=T, K=K, cg=cg, eps=eps)

    # TODO(synk): once pipeline_mode=pl.Buffered(1) is universally supported,
    # single-buffer the four grid-invariant operands below to halve their VMEM.
    out_tc = pl.pallas_call(
        kernel,
        out_shape=jax.ShapeDtypeStruct((B_pad, T, C_out), out_dtype),
        grid_spec=pltpu.PrefetchScalarGridSpec(
            num_scalar_prefetch=0,
            grid=(B_pad // Bb,),
            in_specs=[
                pl.BlockSpec((Bb, T_pad, C_in), lambda b: (b, 0, 0)),
                # Constant index_maps -> these are DMA'd only once across the grid.
                pl.BlockSpec((K * C_in, C_pad_ch), lambda b: (0, 0)),
                pl.BlockSpec((C_pad_ch, n_groups), lambda b: (0, 0)),
                pl.BlockSpec((n_groups, C_pad_ch), lambda b: (0, 0)),
                pl.BlockSpec((8, C_pad_ch), lambda b: (0, 0)),
            ],
            out_specs=pl.BlockSpec((Bb, T, C_out), lambda b: (b, 0, 0)),
            scratch_shapes=[
                pltpu.VMEM((Bb, T, C_pad_ch), jnp.float32),   # conv result
                pltpu.VMEM((Bb, 2, C_pad_ch), jnp.float32),   # per-sample scale/shift
            ],
        ),
        compiler_params=pltpu.CompilerParams(
            dimension_semantics=("parallel",),
            vmem_limit_bytes=vmem_limit,
        ),
    )(x_tc, w_mat, onehot, onehot_t, params)

    out = out_tc[:B] if B_pad != B else out_tc             # drop batch padding
    return jnp.transpose(out, (0, 2, 1))                   # (B, C_out, T), x.dtype


def _reference(x, weight, bias, gamma, beta, n_groups=8, eps=1e-5,
               matmul_dtype=jnp.float32):
    """Pure-JAX reference mirroring the PyTorch module (f32 GroupNorm/Mish)."""
    K = weight.shape[-1]
    pad = K // 2
    y = lax.conv_general_dilated(
        x.astype(matmul_dtype), weight.astype(matmul_dtype),
        window_strides=(1,), padding=[(pad, pad)],
        dimension_numbers=("NCH", "OIH", "NCH"),
        preferred_element_type=jnp.float32)
    y = y + bias[None, :, None]
    B, C, T = y.shape
    yg = y.reshape(B, n_groups, C // n_groups, T)
    mean = yg.mean(axis=(2, 3), keepdims=True)
    var = ((yg - mean) ** 2).mean(axis=(2, 3), keepdims=True)
    yn = (yg - mean) / jnp.sqrt(var + eps)
    yn = yn.reshape(B, C, T) * gamma[None, :, None] + beta[None, :, None]
    return yn * jnp.tanh(jax.nn.softplus(yn))


if __name__ == "__main__":
    B, C_in, C_out, T, K, n_groups = 2, 8, 16, 16, 3, 8

    key = jax.random.PRNGKey(0)
    kx, kw, kb, kg, kbt = jax.random.split(key, 5)
    x = jax.random.normal(kx, (B, C_in, T), jnp.float32)
    weight = jax.random.normal(kw, (C_out, C_in, K), jnp.float32) * 0.2
    bias = jax.random.normal(kb, (C_out,), jnp.float32) * 0.1
    gamma = 1.0 + 0.1 * jax.random.normal(kg, (C_out,), jnp.float32)
    beta = 0.1 * jax.random.normal(kbt, (C_out,), jnp.float32)

    out = diffusion_conv1d_block(x, weight, bias, gamma, beta, n_groups=n_groups)
    out = jax.block_until_ready(out)
    assert out.shape == (B, C_out, T)

    # Tight check vs. a reference whose conv also uses bf16 operands (matches
    # the kernel's MXU numerics; GroupNorm/Mish are f32 in both).
    ref_bf16 = _reference(x, weight, bias, gamma, beta, n_groups=n_groups,
                          matmul_dtype=jnp.bfloat16)
    assert jnp.allclose(out, ref_bf16, atol=1e-2, rtol=1e-2), \
        f"max abs diff vs bf16-conv ref: {jnp.max(jnp.abs(out - ref_bf16))}"

    # Loose check vs. the full-f32 PyTorch-equivalent reference (bf16 conv
    # rounding is the only approximation).
    ref_f32 = _reference(x, weight, bias, gamma, beta, n_groups=n_groups)
    assert jnp.allclose(out, ref_f32, atol=5e-2, rtol=5e-2), \
        f"max abs diff vs f32 ref: {jnp.max(jnp.abs(out - ref_f32))}"

    print("KERNEL_OK")
</pallas_src>

<mosaic_0001>
module attributes {stable_mosaic.version = 11 : i64} {
  func.func @_conv_gn_mish_kernel(%arg0: i32, %arg1: memref<1x18x8xbf16, #tpu.memory_space<vmem>>, %arg2: memref<24x128xbf16, #tpu.memory_space<vmem>>, %arg3: memref<128x8xf32, #tpu.memory_space<vmem>>, %arg4: memref<8x128xf32, #tpu.memory_space<vmem>>, %arg5: memref<8x128xf32, #tpu.memory_space<vmem>>, %arg6: memref<1x16x16xf32, #tpu.memory_space<vmem>>, %arg7: memref<1x16x128xf32, #tpu.memory_space<vmem>>, %arg8: memref<1x2x128xf32, #tpu.memory_space<vmem>>) attributes {dimension_semantics = [#tpu.dimension_semantics<parallel>], iteration_bounds = array<i64: 2>, scalar_prefetch = 0 : i64, scratch_operands = 2 : i64, tpu.core_type = #tpu.core_type<tc>, window_params = [{transform_indices = @transform_0, window_bounds = array<i64: 1, 18, 8>}, {pipeline_mode = #tpu.pipeline_mode<synchronous>, transform_indices = @transform_1, window_bounds = array<i64: 24, 128>}, {pipeline_mode = #tpu.pipeline_mode<synchronous>, transform_indices = @transform_2, window_bounds = array<i64: 128, 8>}, {pipeline_mode = #tpu.pipeline_mode<synchronous>, transform_indices = @transform_3, window_bounds = array<i64: 8, 128>}, {pipeline_mode = #tpu.pipeline_mode<synchronous>, transform_indices = @transform_4, window_bounds = array<i64: 8, 128>}, {transform_indices = @transform_5, window_bounds = array<i64: 1, 16, 16>}]} {
    %c0 = arith.constant 0 : index
    %c0_0 = arith.constant 0 : index
    %c0_1 = arith.constant 0 : index
    %0 = vector.load %arg1[%c0, %c0_0, %c0_1] : memref<1x18x8xbf16, #tpu.memory_space<vmem>>, vector<1x18x8xbf16>
    %1 = vector.extract_strided_slice %0 {offsets = [0, 0, 0], sizes = [1, 16, 8], strides = [1, 1, 1]} : vector<1x18x8xbf16> to vector<1x16x8xbf16>
    %2 = vector.extract_strided_slice %0 {offsets = [0, 1, 0], sizes = [1, 16, 8], strides = [1, 1, 1]} : vector<1x18x8xbf16> to vector<1x16x8xbf16>
    %3 = vector.extract_strided_slice %0 {offsets = [0, 2, 0], sizes = [1, 16, 8], strides = [1, 1, 1]} : vector<1x18x8xbf16> to vector<1x16x8xbf16>
    %4 = tpu.concatenate %1, %2, %3 in 2 : vector<1x16x8xbf16>, vector<1x16x8xbf16>, vector<1x16x8xbf16> -> vector<1x16x24xbf16>
    %5 = vector.shape_cast %4 : vector<1x16x24xbf16> to vector<16x24xbf16>
    %c0_2 = arith.constant 0 : index
    %c0_3 = arith.constant 0 : index
    %6 = vector.load %arg5[%c0_2, %c0_3] : memref<8x128xf32, #tpu.memory_space<vmem>>, vector<8x128xf32>
    %c0_4 = arith.constant 0 : index
    %c0_5 = arith.constant 0 : index
    %7 = vector.load %arg2[%c0_4, %c0_5] : memref<24x128xbf16, #tpu.memory_space<vmem>>, vector<24x128xbf16>
    %cst = arith.constant dense<0.000000e+00> : vector<16x128xf32>
    %8 = tpu.matmul %5, %7, %cst {dimension_numbers = #tpu.dot_dimension_numbers<[1], [0], [0], [1], [0, 0, 1, 1], [], []>} : vector<16x24xbf16>, vector<24x128xbf16>, vector<16x128xf32> -> vector<16x128xf32>
    %9 = vector.extract_strided_slice %6 {offsets = [0, 0], sizes = [1, 128], strides = [1, 1]} : vector<8x128xf32> to vector<1x128xf32>
    %10 = vector.broadcast %9 : vector<1x128xf32> to vector<16x128xf32>
    %11 = arith.addf %8, %10 : vector<16x128xf32>
    %12 = vector.shape_cast %11 : vector<16x128xf32> to vector<1x16x128xf32>
    %c0_6 = arith.constant 0 : index
    %c0_7 = arith.constant 0 : index
    %c0_8 = arith.constant 0 : index
    %13 = vector.load %arg7[%c0_6, %c0_7, %c0_8] : memref<1x16x128xf32, #tpu.memory_space<vmem>>, vector<1x16x128xf32>
    tpu.vector_store %arg7[%c0_6, %c0_7, %c0_8], %12 {strides = array<i32>} : memref<1x16x128xf32, #tpu.memory_space<vmem>>, vector<1x16x128xf32>,
    %c0_9 = arith.constant 0 : index
    %c0_10 = arith.constant 0 : index
    %14 = vector.load %arg3[%c0_9, %c0_10] : memref<128x8xf32, #tpu.memory_space<vmem>>, vector<128x8xf32>
    %c0_11 = arith.constant 0 : index
    %c0_12 = arith.constant 0 : index
    %15 = vector.load %arg4[%c0_11, %c0_12] : memref<8x128xf32, #tpu.memory_space<vmem>>, vector<8x128xf32>
    %cst_13 = arith.constant dense<0.000000e+00> : vector<1x128xf32>
    %16 = vector.multi_reduction <add>, %12, %cst_13 [1] : vector<1x16x128xf32> to vector<1x128xf32>
    %cst_14 = arith.constant dense<0.000000e+00> : vector<1x8xf32>
    %17 = tpu.matmul %16, %14, %cst_14 {dimension_numbers = #tpu.dot_dimension_numbers<[1], [0], [0], [1], [0, 0, 1, 1], [], []>} : vector<1x128xf32>, vector<128x8xf32>, vector<1x8xf32> -> vector<1x8xf32>
    %cst_15 = arith.constant 3.125000e-02 : f32
    %18 = vector.broadcast %cst_15 : f32 to vector<1x8xf32>
    %19 = arith.mulf %17, %18 : vector<1x8xf32>
    %cst_16 = arith.constant dense<0.000000e+00> : vector<1x128xf32>
    %20 = tpu.matmul %19, %15, %cst_16 {dimension_numbers = #tpu.dot_dimension_numbers<[1], [0], [0], [1], [0, 0, 1, 1], [], []>} : vector<1x8xf32>, vector<8x128xf32>, vector<1x128xf32> -> vector<1x128xf32>
    %21 = vector.shape_cast %20 : vector<1x128xf32> to vector<1x1x128xf32>
    %22 = vector.broadcast %21 : vector<1x1x128xf32> to vector<1x16x128xf32>
    %23 = arith.subf %12, %22 : vector<1x16x128xf32>
    %24 = arith.mulf %23, %23 : vector<1x16x128xf32>
    %cst_17 = arith.constant dense<0.000000e+00> : vector<1x128xf32>
    %25 = vector.multi_reduction <add>, %24, %cst_17 [1] : vector<1x16x128xf32> to vector<1x128xf32>
    %cst_18 = arith.constant dense<0.000000e+00> : vector<1x8xf32>
    %26 = tpu.matmul %25, %14, %cst_18 {dimension_numbers = #tpu.dot_dimension_numbers<[1], [0], [0], [1], [0, 0, 1, 1], [], []>} : vector<1x128xf32>, vector<128x8xf32>, vector<1x8xf32> -> vector<1x8xf32>
    %cst_19 = arith.constant 3.125000e-02 : f32
    %27 = vector.broadcast %cst_19 : f32 to vector<1x8xf32>
    %28 = arith.mulf %26, %27 : vector<1x8xf32>
    %cst_20 = arith.constant 9.99999974E-6 : f32
    %29 = vector.broadcast %cst_20 : f32 to vector<1x8xf32>
    %30 = arith.addf %28, %29 : vector<1x8xf32>
    %31 = math.rsqrt %30 : vector<1x8xf32>
    %cst_21 = arith.constant dense<0.000000e+00> : vector<1x128xf32>
    %32 = tpu.matmul %31, %15, %cst_21 {dimension_numbers = #tpu.dot_dimension_numbers<[1], [0], [0], [1], [0, 0, 1, 1], [], []>} : vector<1x8xf32>, vector<8x128xf32>, vector<1x128xf32> -> vector<1x128xf32>
    %33 = vector.extract_strided_slice %6 {offsets = [1, 0], sizes = [1, 128], strides = [1, 1]} : vector<8x128xf32> to vector<1x128xf32>
    %34 = arith.mulf %32, %33 : vector<1x128xf32>
    %35 = vector.extract_strided_slice %6 {offsets = [2, 0], sizes = [1, 128], strides = [1, 1]} : vector<8x128xf32> to vector<1x128xf32>
    %36 = arith.mulf %20, %34 : vector<1x128xf32>
    %37 = arith.subf %35, %36 : vector<1x128xf32>
    %38 = vector.shape_cast %34 : vector<1x128xf32> to vector<1x1x128xf32>
    %c0_22 = arith.constant 0 : index
    %c0_23 = arith.constant 0 : index
    %c0_24 = arith.constant 0 : index
    %39 = vector.load %arg8[%c0_22, %c0_23, %c0_24] : memref<1x2x128xf32, #tpu.memory_space<vmem>>, vector<1x1x128xf32>
    tpu.vector_store %arg8[%c0_22, %c0_23, %c0_24], %38 {strides = array<i32>} : memref<1x2x128xf32, #tpu.memory_space<vmem>>, vector<1x1x128xf32>,
    %40 = vector.shape_cast %37 : vector<1x128xf32> to vector<1x1x128xf32>
    %c0_25 = arith.constant 0 : index
    %c1 = arith.constant 1 : index
    %c0_26 = arith.constant 0 : index
    %41 = vector.load %arg8[%c0_25, %c1, %c0_26] : memref<1x2x128xf32, #tpu.memory_space<vmem>>, vector<1x1x128xf32>
    tpu.vector_store %arg8[%c0_25, %c1, %c0_26], %40 {strides = array<i32>} : memref<1x2x128xf32, #tpu.memory_space<vmem>>, vector<1x1x128xf32>,
    %c0_i32 = arith.constant 0 : i32
    %42 = arith.index_cast %c0_i32 : i32 to index
    %c0_27 = arith.constant 0 : index
    %c0_28 = arith.constant 0 : index
    %43 = vector.load %arg8[%42, %c0_27, %c0_28] : memref<1x2x128xf32, #tpu.memory_space<vmem>>, vector<1x2x128xf32>
    %44 = vector.shape_cast %43 : vector<1x2x128xf32> to vector<2x128xf32>
    %45 = arith.index_cast %c0_i32 : i32 to index
    %c0_29 = arith.constant 0 : index
    %c0_30 = arith.constant 0 : index
    %46 = vector.load %arg7[%45, %c0_29, %c0_30] : memref<1x16x128xf32, #tpu.memory_space<vmem>>, vector<1x16x128xf32>
    %47 = vector.shape_cast %46 : vector<1x16x128xf32> to vector<16x128xf32>
    %48 = vector.extract_strided_slice %44 {offsets = [0, 0], sizes = [1, 128], strides = [1, 1]} : vector<2x128xf32> to vector<1x128xf32>
    %49 = vector.broadcast %48 : vector<1x128xf32> to vector<16x128xf32>
    %50 = arith.mulf %47, %49 : vector<16x128xf32>
    %51 = vector.extract_strided_slice %44 {offsets = [1, 0], sizes = [1, 128], strides = [1, 1]} : vector<2x128xf32> to vector<1x128xf32>
    %52 = vector.broadcast %51 : vector<1x128xf32> to vector<16x128xf32>
    %53 = arith.addf %50, %52 : vector<16x128xf32>
    %cst_31 = arith.constant 2.000000e+01 : f32
    %54 = vector.broadcast %cst_31 : f32 to vector<16x128xf32>
    %55 = arith.minimumf %53, %54 : vector<16x128xf32>
    %56 = math.exp %55 : vector<16x128xf32>
    %cst_32 = arith.constant 2.000000e+00 : f32
    %57 = vector.broadcast %cst_32 : f32 to vector<16x128xf32>
    %58 = arith.addf %56, %57 : vector<16x128xf32>
    %59 = arith.mulf %56, %58 : vector<16x128xf32>
    %60 = arith.mulf %53, %59 : vector<16x128xf32>
    %cst_33 = arith.constant 2.000000e+00 : f32
    %61 = vector.broadcast %cst_33 : f32 to vector<16x128xf32>
    %62 = arith.addf %59, %61 : vector<16x128xf32>
    %63 = tpu.reciprocal %62 {approx = true} : vector<16x128xf32> -> vector<16x128xf32>
    %64 = arith.mulf %60, %63 : vector<16x128xf32>
    %cst_34 = arith.constant 2.000000e+01 : f32
    %65 = vector.broadcast %cst_34 : f32 to vector<16x128xf32>
    %66 = arith.cmpf ogt, %53, %65 : vector<16x128xf32>
    %67 = arith.select %66, %53, %64 : vector<16x128xi1>, vector<16x128xf32>
    %68 = vector.extract_strided_slice %67 {offsets = [0, 0], sizes = [16, 16], strides = [1, 1]} : vector<16x128xf32> to vector<16x16xf32>
    %69 = arith.index_cast %c0_i32 : i32 to index
    %c0_35 = arith.constant 0 : index
    %c0_36 = arith.constant 0 : index
    %70 = vector.load %arg6[%69, %c0_35, %c0_36] : memref<1x16x16xf32, #tpu.memory_space<vmem>>, vector<1x16x16xf32>
    %71 = vector.shape_cast %70 : vector<1x16x16xf32> to vector<16x16xf32>
    %72 = vector.shape_cast %68 : vector<16x16xf32> to vector<1x16x16xf32>
    tpu.vector_store %arg6[%69, %c0_35, %c0_36], %72 {strides = array<i32>} : memref<1x16x16xf32, #tpu.memory_space<vmem>>, vector<1x16x16xf32>,
    %c1_i32 = arith.constant 1 : i32
    return
  }
  func.func @transform_0(%arg0: i32) -> (i32, i32, i32) {
    %c0_i32 = arith.constant 0 : i32
    %c0_i32_0 = arith.constant 0 : i32
    %c0_i32_1 = arith.constant 0 : i32
    return %arg0, %c0_i32, %c0_i32_0 : i32, i32, i32
  }
  func.func @transform_1(%arg0: i32) -> (i32, i32) {
    %c0_i32 = arith.constant 0 : i32
    %c0_i32_0 = arith.constant 0 : i32
    %c0_i32_1 = arith.constant 0 : i32
    return %c0_i32, %c0_i32_0 : i32, i32
  }
  func.func @transform_2(%arg0: i32) -> (i32, i32) {
    %c0_i32 = arith.constant 0 : i32
    %c0_i32_0 = arith.constant 0 : i32
    %c0_i32_1 = arith.constant 0 : i32
    return %c0_i32, %c0_i32_0 : i32, i32
  }
  func.func @transform_3(%arg0: i32) -> (i32, i32) {
    %c0_i32 = arith.constant 0 : i32
    %c0_i32_0 = arith.constant 0 : i32
    %c0_i32_1 = arith.constant 0 : i32
    return %c0_i32, %c0_i32_0 : i32, i32
  }
  func.func @transform_4(%arg0: i32) -> (i32, i32) {
    %c0_i32 = arith.constant 0 : i32
    %c0_i32_0 = arith.constant 0 : i32
    %c0_i32_1 = arith.constant 0 : i32
    return %c0_i32, %c0_i32_0 : i32, i32
  }
  func.func @transform_5(%arg0: i32) -> (i32, i32, i32) {
    %c0_i32 = arith.constant 0 : i32
    %c0_i32_0 = arith.constant 0 : i32
    %c0_i32_1 = arith.constant 0 : i32
    return %arg0, %c0_i32, %c0_i32_0 : i32, i32, i32
  }
}

</mosaic_0001>

<bundles_post_ra>
// kernel: tpu_custom_call.1
= control target key start
LH: loop header
LB: loop body
LE: loop exit
PB: predicated region body
PF: predicated region fallthrough
CT: control target
= control target key end

     0   :  { %10 = vsyncpa [#allocation5], 0  ;;  %s884_s0 = inlined_call_operand.vmem [shape: bf16[2,18,8], index: 0, kind: input, shape index: {}]   ;;  %s885_s1 = inlined_call_operand.vmem [shape: bf16[24,128], index: 1, kind: input, shape index: {}]   ;;  %s886_s2 = inlined_call_operand.vmem [shape: f32[128,8], index: 2, kind: input, shape index: {}]   ;;  %s887_s3 = inlined_call_operand.vmem [shape: f32[8,128], index: 3, kind: input, shape index: {}]   ;;  %s888_s4 = inlined_call_operand.vmem [shape: f32[8,128], index: 4, kind: input, shape index: {}]   ;;  %s889_s5 = inlined_call_operand.hbm [shape: f32[2,16,16], index: 5, kind: output, shape index: {}]  }
   0x1   :  { %12 = vsyncpa [#allocation5 + $0x1], 0  ;;  %s731_s18 = smov 0   ;;  %s733_s19 = smov 0  }
   0x2   :  { %s735_s20 = smov 0   ;;  %s737_s21 = smov 0  }
   0x3 LB: > { %s752_s22 = sadd.s32 4294967295, %s696_s21   ;;  %s556_s23 = sadd.s32 4294967294, %s696_s21   ;;  %s696_s21 = sphi %s737_s21, %s895_s21   ;;  %s692_s20 = sphi %s735_s20, %s894_s20   ;;  %s688_s19 = sphi %s733_s19, %s893_s19   ;;  %s684_s18 = sphi %s731_s18, %s892_s18  }
   0x4   : > { %s756_s24 = sadd.s32 1, %s696_s21   ;;  %s135_s25 = sadd.s32 1, %s692_s20 }
   0x5   : > { %s132_s26 = ssub.s32 %s696_s21, %s756_s24  ;;  %p145_p0 = scmp.ne.s32.totalorder %s692_s20, %s688_s19 }
   0x6   : > { %p133_p1 = scmp.eq.s32.totalorder %s132_s26, 0  ;;  %p146_p2 = scmp.eq.s32.totalorder %s752_s22, 1 }
   0x7   : > { %p151_p3 = scmp.ne.s32.totalorder %s688_s19, %s684_s18  ;;  %p152_p4 = scmp.eq.s32.totalorder %s556_s23, 1 }
   0x8   : > { %s767_s27 = scalar_select %p133_p1, %s692_s20, %s135_s25  }
   0x9   : > { %p769_p5 = por %p146_p2, %p145_p0  ;;  %p773_p6 = por %p152_p4, %p151_p3 }
   0xa   : > { %p559_p7 = scmp.ge.s32.totalorder %s696_s21, 1  ;;  %p190_p8 = scmp.lt.s32.totalorder %s696_s21, 3 }
   0xc   : > { %p191_p9 = pnand %p559_p7, %p190_p8 }
   0xd   : > { %p218_p10 = scmp.lt.s32.totalorder (!%p191_p9), %s752_s22, 1  ;;  %s698_s10 = smov (!%p191_p9), 8  }
   0xe   : > { %194 = sbr.rel (%p191_p9) target bundleno = 928 (0x3a0), region = 40  ;;  %s699_s11 = smov (!%p191_p9), 16  }
   0xf   : > { %s580_s8 = sshll.u32 (!%p191_p9), %s752_s22, 4  ;;  %s654_s26 = scalar_lea.hbm (!%p191_p9), %s889_s5, 32 }
  0x10   : > { %s490_s12 = scalar_lea.hbm (!%p191_p9), %s889_s5, %s580_s8 }
  0x11   : > { %s493_s15 = sshll.u32 (!%p191_p9), %s490_s12, 4  ;;  %s494_s15 = int_to_ptr.hbm [resolvable:$true] %s493_s15 }
  0x12   : > { %s648_s16 = sshra.s32 (!%p191_p9), %s494_s15, 4  ;;  %s649_s16 = int_to_ptr.hbm [resolvable:$true] %s648_s16 }
  0x13   : > { %s219_s30 = scalar_select %p218_p10, %s752_s22, 1  ;;  %vm235_vm0 = vsmask.f32 7424  ;;  %vm250_vm1 = vcmask 1046528   ;;  %v265_v14 = vld [vmem:[%s885_s1 + $0x8] sm:$0xf] }
  0x14   : > { %v272_v15 = vunpack.c.l.b16 %v265_v14  ;;  %vm279_vm2 = vcmask 1043456   ;;  %v579_v18 = vld [vmem:[%s885_s1] sm:$0xff]  ;;  %v314_v19 = vld [vmem:[%s886_s2 + $0x78] sm:$0xff]  ;;  %v313_v20 = vld [vmem:[%s886_s2 + $0x70] sm:$0xff]  ;;  %vm256_vm3 = vcmask 64512   ;;  %vm259_vm4 = vcmask 130048   ;;  %p655_p0 = scmp.lt.s32.totalorder %s649_s16, %s889_s5 }
  0x15   : > { %s581_s6 = smul.u32 12, %s219_s30  ;;  %323 = vmatpush.msra.mxu1 %v314_v19  ;;  %379 = vmatpush.msra.mxu3 %v314_v19  ;;  %v312_v21 = vld [vmem:[%s886_s2 + $0x68] sm:$0xff]  ;;  %vm276_vm5 = vcmask 195584   ;;  %v311_v26 = vld [vmem:[%s886_s2 + $0x60] sm:$0xff]  ;;  %v310_v27 = vld [vmem:[%s886_s2 + $0x58] sm:$0xff]  ;;  %s650_s17 = scalar_lea.hbm %s649_s16, 16 }
  0x16   : > { %v274_v16 = vpack.c.b16 %v272_v15, %v272_v15  ;;  %v309_v28 = vld [vmem:[%s886_s2 + $0x50] sm:$0xff]  ;;  %v308_v29 = vld [vmem:[%s886_s2 + $0x48] sm:$0xff]  ;;  %v307_v30 = vld [vmem:[%s886_s2 + $0x40] sm:$0xff]  ;;  %p651_p11 = scmp.ne.s32.totalorder %s649_s16, %s650_s17  ;;  %p656_p1 = scmp.lt.s32.totalorder %s654_s26, %s650_s17 }
  0x17   : > { %s222_s9 = scalar_lea.vmem %s884_s0, %s581_s6  ;;  %324 = vmatpush.msra.mxu1 %v313_v20  ;;  %380 = vmatpush.msra.mxu3 %v313_v20  ;;  %v306_v31 = vld [vmem:[%s886_s2 + $0x38] sm:$0xff]  ;;  %v305_v32 = vld [vmem:[%s886_s2 + $0x30] sm:$0xff]  ;;  %v304_v33 = vld [vmem:[%s886_s2 + $0x28] sm:$0xff]  ;;  %s215_s6 = sand.u32 1, %s688_s19  }
  0x18   : > { %v578_v0 = vld [vmem:[%s222_s9] sm:$0xff]  ;;  %v226_v1 = vld [vmem:[%s222_s9 + $0x8] sm:$0x1]  ;;  %v281_v17 = vsel %vm279_vm2, %v274_v16, 0  ;;  %v302_v35 = vld [vmem:[%s886_s2 + $0x18] sm:$0xff]  ;;  %s560_s7 = sshll.u32 %s215_s6, 4  ;;  %p652_p12 = pnand %p651_p11, %p769_p5 }
  0x19   : > { %v233_v2 = vunpack.c.l.b16 %v226_v1  ;;  %v237_v3 = vshrl.u32 %v578_v0, 16  ;;  %v239_v4 = vshll.u32 %v578_v0, 16  ;;  %v251_v11 = vrot.slane %v578_v0, 1  ;;  %289 = vmatpush.bf16.msra.mxu0 %v281_v17  ;;  %325 = vmatpush.msra.mxu1 %v312_v21  ;;  %v303_v34 = vld [vmem:[%s886_s2 + $0x20] sm:$0xff]  ;;  %v301_v36 = vld [vmem:[%s886_s2 + $0x10] sm:$0xff]  ;;  %v300_v37 = vld [vmem:[%s886_s2 + $0x8] sm:$0xff]  ;;  %p657_p2 = por %p656_p1, %p655_p0 }
  0x1a   : > { %381 = vmatpush.msra.mxu3 %v312_v21  ;;  %v299_v38 = vld [vmem:[%s886_s2] sm:$0xff]  ;;  %s217_s13 = scalar_lea.vmem [#allocation4], %s560_s7  ;;  %s479_s22 = scalar_lea.sflag [#allocation5], %s215_s6 }
  0x1b   : > { %v234_v5 = vpack.c.b16 %v233_v2, %v233_v2  ;;  %v241_v6 = vrot.slane %v239_v4, 1  ;;  %326 = vmatpush.msra.mxu1 %v311_v26  ;;  %v262_v40 = vld [vmem:[%s888_s4] sm:$0xff]  ;;  %s491_s14 = sshll.u32 %s217_s13, 4  ;;  %p653_p13 = pneg %p652_p12  ;;  %s492_s14 = int_to_ptr.vmem [resolvable:$true] %s491_s14 }
  0x1c   : > { %382 = vmatpush.msra.mxu3 %v311_v26  ;;  %v266_v41 = vperm.slane %v262_v40, 0  ;;  %v315_v52 = vld [vmem:[%s887_s3] sm:$0xff]  ;;  %v435_v14 = vrot.slane %v262_v40, 1 }
  0x1d   : > { %v244_v7 = vshll.u32 %v234_v5, 16  ;;  %v242_v8 = vor.u32 %v241_v6, %v237_v3  ;;  %v252_v12 = vrot.slane %v234_v5, 1  ;;  %290 = vmatpush.bf16.msra.mxu0 %v579_v18  ;;  %327 = vmatpush.msra.mxu1 %v310_v27  ;;  %p658_p3 = pnand %p657_p2, %p653_p13 }
  0x1e   : > { %383 = vmatpush.msra.mxu3 %v310_v27  ;;  %362 = vmatpush.msra.mxu2 %v315_v52 }
  0x1f   : > { %v246_v9 = vrot.slane %v244_v7, 1  ;;  %v253_v13 = vsel %vm250_vm1, %v251_v11, %v252_v12  ;;  %328 = vmatpush.msra.mxu1 %v309_v28 }
  0x20   : > { %384 = vmatpush.msra.mxu3 %v309_v28  ;;  %429 = vmatpush.msrb.mxu2 %v315_v52 }
  0x21   : > { %v247_v10 = vsel %vm235_vm0, %v242_v8, %v246_v9  ;;  %329 = vmatpush.msra.mxu1 %v308_v29 }
  0x22   : > { %248 = vrot.lane.b32.xlu0 %v247_v10, %s698_s10  ;;  %385 = vmatpush.msra.mxu3 %v308_v29 }
  0x23   : > { %330 = vmatpush.msra.mxu1 %v307_v30 }
  0x24   : > { %386 = vmatpush.msra.mxu3 %v307_v30 }
  0x25   : > { %331 = vmatpush.msra.mxu1 %v306_v31 }
  0x26   : > { %387 = vmatpush.msra.mxu3 %v306_v31 }
  0x27   : > { %332 = vmatpush.msra.mxu1 %v305_v32 }
  0x28   : > { %388 = vmatpush.msra.mxu3 %v305_v32 }
  0x29   : > { %333 = vmatpush.msra.mxu1 %v304_v33 }
  0x2a   : > { %254 = vrot.lane.b32.xlu0 %v253_v13, %s699_s11  ;;  %389 = vmatpush.msra.mxu3 %v304_v33 }
  0x2b   : > { %334 = vmatpush.msra.mxu1 %v303_v34 }
  0x2c   : > { %390 = vmatpush.msra.mxu3 %v303_v34 }
  0x2d   : > { %335 = vmatpush.msra.mxu1 %v302_v35 }
  0x2e   : > { %391 = vmatpush.msra.mxu3 %v302_v35 }
  0x2f   : > { %336 = vmatpush.msra.mxu1 %v301_v36 }
  0x30   : > { %392 = vmatpush.msra.mxu3 %v301_v36 }
  0x31   : > { %337 = vmatpush.msra.mxu1 %v300_v37 }
  0x32   : > { %393 = vmatpush.msra.mxu3 %v300_v37 }
  0x33   : > { %338 = vmatpush.msra.mxu1 %v299_v38 }
  0x34   : > { %394 = vmatpush.msra.mxu3 %v299_v38 }
  0x94   : > { %v249_v22 = vpop.permute.xlu0 %248 }
  0x95   : > { %v258_v23 = vsel %vm256_vm3, %v578_v0, %v249_v22 }
  0x9c   : > { %v255_v24 = vpop.permute.xlu0 %254 }
  0x9d   : > { %v261_v25 = vsel %vm259_vm4, %v258_v23, %v255_v24 }
  0x9e   : > { %570 = vmatmul.msk.bf16.vlgmr.msra.gmra.mxu0 %vm276_vm5, %v261_v25 }
 0x11b   : > { %v292_v39 = vpop.f32.mrf.mxu0 }
 0x11c   : > { %v293_v43 = vadd.f32 %v292_v39, %v266_v41 }
 0x123   : > { %v294_v42 = vpop.f32.mrf.mxu0 }
 0x124   : > { %v295_v44 = vadd.f32 %v294_v42, %v266_v41 }
 0x126   : > { %v316_v45 = vadd.f32 %v295_v44, %v293_v43 }
 0x128   : > { %v317_v46 = vrot.slane %v316_v45, 4 }
 0x12a   : > { %v318_v47 = vadd.f32 %v317_v46, %v316_v45 }
 0x12c   : > { %v319_v48 = vrot.slane %v318_v47, 2 }
 0x12e   : > { %v320_v49 = vadd.f32 %v319_v48, %v318_v47 }
 0x130   : > { %v321_v50 = vrot.slane %v320_v49, 1 }
 0x132   : > { %v322_v51 = vadd.f32 %v321_v50, %v320_v49 }
 0x134   : > { %339 = vmatmul.f32.vlgmr.msra.gmra.mxu1 %v322_v51 }
 0x1b1   : > { %v340_v53 = vpop.f32.mrf.mxu1 }
 0x1b2   : > { %v343_v54 = vmul.f32 0.03125, %v340_v53 }
 0x1b4   : > { %571 = vmatmul.msk.f32.vlgmr.msra.gmra.mxu2 %vm256_vm3, %v343_v54 }
 0x237   : > { %v364_v55 = vpop.f32.mrf.mxu2 }
 0x238   : > { %v367_v56 = vperm.slane %v364_v55, 0 }
 0x23a   : > { %v368_v57 = vsub.f32 %v293_v43, %v367_v56  ;;  %v369_v58 = vsub.f32 %v295_v44, %v367_v56 }
 0x23c   : > { %v370_v59 = vmul.f32 %v368_v57, %v368_v57  ;;  %v371_v60 = vmul.f32 %v369_v58, %v369_v58 }
 0x23e   : > { %v372_v61 = vadd.f32 %v371_v60, %v370_v59 }
 0x240   : > { %v373_v62 = vrot.slane %v372_v61, 4 }
 0x242   : > { %v374_v63 = vadd.f32 %v373_v62, %v372_v61 }
 0x244   : > { %v375_v0 = vrot.slane %v374_v63, 2 }
 0x246   : > { %v376_v1 = vadd.f32 %v375_v0, %v374_v63 }
 0x248   : > { %v377_v2 = vrot.slane %v376_v1, 1 }
 0x24a   : > { %v378_v3 = vadd.f32 %v377_v2, %v376_v1 }
 0x24c   : > { %395 = vmatmul.f32.vlgmr.msra.gmra.mxu3 %v378_v3 }
 0x2cf   : > { %v396_v4 = vpop.f32.mrf.mxu3 }
 0x2d0   : > { %v399_v5 = vmul.f32 0.03125, %v396_v4 }
 0x2d2   : > { %v400_v6 = vadd.f32 1e-05, %v399_v5 }
 0x2d4   : > { %624 = vrsqrt.f32 %v400_v6  ;;  %vm407_vm7 = vweird.f32 %v400_v6 }
 0x2da   : > { %v625_v7 = vpop.eup %624 }
 0x2db   : > { %v402_v8 = vmul.f32 %v625_v7, %v400_v6  ;;  %vm408_vm6 = vweird.f32 %v625_v7 }
 0x2dc   : > { %vm409_vm8 = vmor %vm407_vm7, %vm408_vm6 }
 0x2dd   : > { %v403_v9 = vmul.f32 %v625_v7, %v402_v8 }
 0x2df   : > { %v404_v10 = vmul.f32 0.5, %v403_v9 }
 0x2e1   : > { %v405_v11 = vsub.f32 1.5, %v404_v10 }
 0x2e3   : > { %v406_v12 = vmul.f32 %v625_v7, %v405_v11 }
 0x2e5   : > { %v410_v13 = vsel %vm409_vm8, %v625_v7, %v406_v12 }
 0x2e6   : > { %572 = vmatmul.msk.f32.vlgmr.msrb.gmra.mxu2 %vm256_vm3, %v410_v13 }
 0x369   : > { %v431_v15 = vpop.f32.mrf.mxu2 }
 0x36a   : > { %v437_v16 = vmul.f32 %v435_v14, %v431_v15 }
 0x36c   : > { %v438_v17 = vmul.f32 %v437_v16, %v364_v55  ;;  %443 = vst [vmem:[#allocation3] sm:$0x1] %v437_v16 }
 0x36e   : > { %v440_v18 = vrot.slane %v438_v17, 6 }
 0x370   : > { %v442_v19 = vsub.f32 %v262_v40, %v440_v18 }
 0x372   : > { %444 = vst [vmem:[#allocation3 - $0x1] sm:$0x4] %v442_v19 }
 0x379   : > { %v445_v20 = vld [vmem:[#allocation3] sm:$0x3] }
 0x37a   : > { %v448_v21 = vperm.slane %v445_v20, 0  ;;  %v451_v24 = vperm.slane %v445_v20, 1 }
 0x37c   : > { %v449_v22 = vmul.f32 %v448_v21, %v293_v43  ;;  %v450_v23 = vmul.f32 %v448_v21, %v295_v44 }
 0x37e   : > { %v452_v25 = vadd.f32 %v451_v24, %v449_v22  ;;  %v453_v26 = vadd.f32 %v451_v24, %v450_v23 }
 0x380   : > { %v454_v27 = vmin.f32 %v452_v25, 20.0  ;;  %v455_v28 = vmin.f32 %v453_v26, 20.0  ;;  %vm472_vm9 = vcmp.gt.f32.partialorder %v452_v25, 20.0  ;;  %vm473_vm10 = vcmp.gt.f32.partialorder %v453_v26, 20.0 }
 0x382   : > { %v456_v29 = vmul.f32 1.442695, %v454_v27  ;;  %v458_v30 = vmul.f32 1.442695, %v455_v28 }
 0x384   : > { %626 = vpow2.f32 %v456_v29 }
 0x385   : > { %628 = vpow2.f32 %v458_v30 }
 0x38a   : > { %v627_v31 = vpop.eup %626 }
 0x38b   : > { %v629_v32 = vpop.eup %628  ;;  %v460_v33 = vadd.f32 2.0, %v627_v31 }
 0x38c   : > { %v461_v34 = vadd.f32 2.0, %v629_v32 }
 0x38d   : > { %v462_v35 = vmul.f32 %v627_v31, %v460_v33 }
 0x38e   : > { %v463_v36 = vmul.f32 %v629_v32, %v461_v34 }
 0x38f   : > { %v466_v37 = vadd.f32 2.0, %v462_v35  ;;  %v464_v39 = vmul.f32 %v462_v35, %v452_v25 }
 0x390   : > { %v467_v38 = vadd.f32 2.0, %v463_v36  ;;  %v465_v41 = vmul.f32 %v463_v36, %v453_v26 }
 0x391   : > { %630 = vrcp.f32 %v466_v37 }
 0x392   : > { %632 = vrcp.f32 %v467_v38 }
 0x397   : > { %v631_v40 = vpop.eup %630 }
 0x398   : > { %v633_v42 = vpop.eup %632  ;;  %v470_v43 = vmul.f32 %v631_v40, %v464_v39 }
 0x399   : > { %v471_v44 = vmul.f32 %v633_v42, %v465_v41 }
 0x39a   : > { %v474_v45 = vsel %vm472_vm9, %v452_v25, %v470_v43 }
 0x39b   : > { %v475_v46 = vsel %vm473_vm10, %v453_v26, %v471_v44  ;;  %476 = vst.msk [vmem:[%s217_s13] sm:$0xff] %vm259_vm4, %v474_v45 }
 0x39c   : > { %477 = vst.msk [vmem:[%s217_s13 + $0x8] sm:$0xff] %vm259_vm4, %v475_v46 }
 0x39d   : > { %661 = shalt.err (!%p658_p3)
}
 0x39e   : > { %s700_s6 = smov 128  }
 0x39f   : > { %582 = dma.vmem_to_hbm [thread:$0]  (%p769_p5), %s492_s14, 256, %s494_s15, %s479_s22, %s700_s6, %s700_s6, %s698_s10  }
 0x3a0 PF: > { %p588_p4 = scmp.ge.s32.totalorder %s696_s21, 2  ;;  %s508_s8 = sand.u32 1, %s684_s18  }
 0x3a1   : > { %s509_s9 = scalar_lea.sflag [#allocation5], %s508_s8 }
 0x3a2   : > { %p585_p7 = pnand %p588_p4, %p773_p6 }
 0x3a4   : > { %p586_p8 = pneg %p585_p7 }
 0x3a6   : > { %679 = dma.done.wait (%p586_p8), %s509_s9, 256  }
 0x3a7   : > { %681 = vsyncadd (%p586_p8), %s509_s9, 4294967040  ;;  %p15_p9 = scmp.ge.s32.totalorder %s756_s24, 4   ;;  %s892_s18 = smov %s688_s19 }
 0x3a8   : > { %s893_s19 = smov %s692_s20  ;;  %s894_s20 = smov %s767_s27 }
 0x3a9   : > { %s895_s21 = smov %s756_s24  ;;  %17 = sbr.rel (!%p15_p9) target bundleno = 3 (0x3), region = 75 }
 0x3ae   :  { %515 = vsyncpa [#allocation5], 1 }
 0x3af   :  { %517 = vsyncpa [#allocation5 + $0x1], 1 }

</bundles_post_ra>
